<compile_context>
chip_gen: v7x
topology: tpu7x:2x2x1
jax: 0.10.0
libtpu: 0.0.40
codegen_flags: <defaults>
</compile_context>

<pallas_src>
import functools
import math

import numpy as np
import jax
import jax.numpy as jnp
from jax.experimental import pallas as pl
from jax.experimental.pallas import tpu as pltpu


# ----------------------------------------------------------------------------
# Fused kernel body
# ----------------------------------------------------------------------------

def _mm(x_f32, w_ref):
    """bf16 MXU matmul with f32 accumulation."""
    return jnp.dot(x_f32.astype(jnp.bfloat16), w_ref[...],
                   preferred_element_type=jnp.float32)


def _linear_lrelu(x, w_ref, b_ref):
    h = _mm(x, w_ref) + b_ref[...]          # bias (1, F) broadcast, f32
    # LeakyReLU(0.2); Dropout(0.2) is inference-mode identity.
    return jnp.where(h > 0, h, 0.2 * h)


def _fade_stage(x, alpha, w_ref, b_ref, pool_ref):
    hi = _linear_lrelu(x, w_ref, b_ref)     # linear_{s}_to_{s/2}
    lo = _mm(x, pool_ref)                   # AvgPool2d(2) as x @ P on the MXU
    return hi * alpha + lo * (1.0 - alpha)  # progressive fade-in blend


def _fused_fwd_kernel(alpha_ref, *refs, level):
    out_ref = refs[-1]
    ins = refs[:-1]
    alpha = alpha_ref[0, 0]                 # runtime scalar from SMEM (no recompile)
    x = ins[0][...]
    i = 1
    if level == 3:                          # 32x32 -> 16x16
        x = _fade_stage(x, alpha, ins[i], ins[i + 1], ins[i + 2]); i += 3
    if level >= 2:                          # 16x16 -> 8x8
        x = _fade_stage(x, alpha, ins[i], ins[i + 1], ins[i + 2]); i += 3
    w1, b1, w2, b2 = ins[i], ins[i + 1], ins[i + 2], ins[i + 3]
    h = _linear_lrelu(x, w1, b1)            # image2score: Linear(64,128)+LReLU(+Dropout id)
    out_ref[...] = _mm(h, w2) + b2[...]     # Linear(128,2) zero-padded to 128 lanes


# ----------------------------------------------------------------------------
# Wrapper
# ----------------------------------------------------------------------------

def _pad_batch(x):
    B = x.shape[0]
    if B <= 512:
        b_pad = -(-B // 8) * 8       # sublane-align; single whole-batch block
        tile = b_pad
    else:
        b_pad = -(-B // 256) * 256   # 256-row tiles -> parallel grid (v7x 2 TCs)
        tile = 256
    if b_pad != B:
        x = jnp.pad(x, ((0, b_pad - B), (0, 0)))
    return x, tile


@functools.partial(jax.jit, static_argnames=("level",))
def discriminator_forward(params, img, level=0, alpha=0.0):
    B = img.shape[0]
    x = img.reshape(B, -1).astype(jnp.float32)          # img.view(B, -1)
    x, tile_b = _pad_batch(x)
    b_pad, K = x.shape
    alpha_arr = jnp.asarray(alpha, jnp.float32).reshape(1, 1)

    operands = [x]
    if level == 3:
        operands += [*params["l32to16"], params["pool32"]]
    if level >= 2:
        operands += [*params["l16to8"], params["pool16"]]
    operands += [*params["score1"], *params["score2"]]

    in_specs = [
        pl.BlockSpec((1, 1), lambda i: (0, 0),
                     memory_space=pltpu.MemorySpace.SMEM),    # alpha scalar
        pl.BlockSpec((tile_b, K), lambda i: (i, 0)),          # batch-tiled activations
    ] + [
        # weights / pooling matrices: full arrays, stay resident across batch tiles
        pl.BlockSpec(op.shape, lambda i: (0, 0)) for op in operands[1:]
    ]
    out_spec = pl.BlockSpec((tile_b, 128), lambda i: (i, 0))  # lane-dense output

    flops_per_row = 2 * (64 * 128 + 128 * 128)
    if level >= 2:
        flops_per_row += 2 * 2 * 256 * 64
    if level == 3:
        flops_per_row += 2 * 2 * 1024 * 256
    bytes_accessed = b_pad * 128 * 4 + sum(
        int(op.size) * op.dtype.itemsize for op in operands)
    cost = pl.CostEstimate(flops=int(b_pad) * flops_per_row, transcendentals=0,
                           bytes_accessed=int(bytes_accessed))

    out = pl.pallas_call(
        functools.partial(_fused_fwd_kernel, level=level),
        out_shape=jax.ShapeDtypeStruct((b_pad, 128), jnp.float32),
        grid=(b_pad // tile_b,),
        in_specs=in_specs,
        out_specs=out_spec,
        compiler_params=pltpu.CompilerParams(
            dimension_semantics=("parallel",)),
        cost_estimate=cost,
    )(alpha_arr, *operands)
    return out[:B, :2]


# ----------------------------------------------------------------------------
# Parameter init (mimics PyTorch Linear's U(-1/sqrt(in), 1/sqrt(in)))
# ----------------------------------------------------------------------------

def _init_linear(key, fan_in, fan_out, pad_out=None):
    kw, kb = jax.random.split(key)
    bound = 1.0 / math.sqrt(fan_in)
    w = jax.random.uniform(kw, (fan_in, fan_out), jnp.float32, -bound, bound)
    b = jax.random.uniform(kb, (1, fan_out), jnp.float32, -bound, bound)
    if pad_out is not None and pad_out > fan_out:
        # Zero-pad output features to 128 -> unmasked lane-dense stores.
        w = jnp.pad(w, ((0, 0), (0, pad_out - fan_out)))
        b = jnp.pad(b, ((0, 0), (0, pad_out - fan_out)))
    return w.astype(jnp.bfloat16), b      # bf16 MXU operand, f32 bias


def _make_pool_matrix(size):
    """AvgPool2d(2) over a flattened (size,size) image as a (size^2,(size/2)^2) matmul."""
    half = size // 2
    p = np.zeros((size * size, half * half), dtype=np.float32)
    for i in range(half):
        for j in range(half):
            o = i * half + j
            for di in (0, 1):
                for dj in (0, 1):
                    p[(2 * i + di) * size + (2 * j + dj), o] = 0.25
    return jnp.asarray(p, dtype=jnp.bfloat16)   # 0.25 is exact in bf16


def init_discriminator_params(key):
    ks = jax.random.split(key, 5)
    return {
        "score1": _init_linear(ks[0], 64, 128),                # image2score Linear(64,128)
        "score2": _init_linear(ks[1], 128, 2, pad_out=128),    # Linear(128,2) padded to 128
        "l8to4": _init_linear(ks[2], 4 * 4 * 4, 4 * 4),        # defined but unused in forward
        "l16to8": _init_linear(ks[3], 8 * 8 * 4, 8 * 8),
        "l32to16": _init_linear(ks[4], 16 * 16 * 4, 16 * 16),
        "pool16": _make_pool_matrix(16),
        "pool32": _make_pool_matrix(32),
    }


# ----------------------------------------------------------------------------
# Pure-JAX reference (same bf16-stored weights, inference-mode dropout)
# ----------------------------------------------------------------------------

def _avg_pool2_flat(x_flat, batch_size, size):
    x = x_flat.reshape(batch_size, 1, size, size)
    p = x.reshape(batch_size, 1, size // 2, 2, size // 2, 2).mean(axis=(3, 5))
    return p.reshape(batch_size, -1)


def discriminator_forward_ref(params, img, level=0, alpha=0.0):
    def lrelu(v):
        return jnp.where(v > 0, v, 0.2 * v)

    B = img.shape[0]
    x = img.reshape(B, -1).astype(jnp.float32)
    if level == 3:
        w, b = params["l32to16"]
        x = lrelu(x @ w.astype(jnp.float32) + b) * alpha \
            + _avg_pool2_flat(x, B, 32) * (1 - alpha)
    if level >= 2:
        w, b = params["l16to8"]
        x = lrelu(x @ w.astype(jnp.float32) + b) * alpha \
            + _avg_pool2_flat(x, B, 16) * (1 - alpha)
    w1, b1 = params["score1"]
    w2, b2 = params["score2"]
    h = lrelu(x @ w1.astype(jnp.float32) + b1)
    return (h @ w2.astype(jnp.float32) + b2)[:, :2]


# NOTE: nn.Dropout(0.2) is implemented as inference-mode identity (deterministic).
# TODO(synk): training-mode stochastic dropout would need pltpu.prng_random_bits.

if __name__ == "__main__":
    key = jax.random.PRNGKey(0)
    pkey, xkey8, xkey16, xkey32 = jax.random.split(key, 4)
    params = init_discriminator_params(pkey)

    # Module default state: level=0, alpha=0 -> img is (B, 1, 8, 8) -> 64 features.
    x8 = jax.random.normal(xkey8, (4, 1, 8, 8), jnp.float32)
    out0 = jax.block_until_ready(discriminator_forward(params, x8, level=0, alpha=0.0))
    ref0 = discriminator_forward_ref(params, x8, level=0, alpha=0.0)
    assert out0.shape == (4, 2)
    assert jnp.allclose(out0, ref0, atol=2e-2, rtol=2e-2), float(jnp.max(jnp.abs(out0 - ref0)))

    # level=2 path with fade-in: img is (B, 1, 16, 16).
    x16 = jax.random.normal(xkey16, (4, 1, 16, 16), jnp.float32)
    out2 = jax.block_until_ready(discriminator_forward(params, x16, level=2, alpha=0.3))
    ref2 = discriminator_forward_ref(params, x16, level=2, alpha=0.3)
    assert out2.shape == (4, 2)
    assert jnp.allclose(out2, ref2, atol=2e-2, rtol=2e-2), float(jnp.max(jnp.abs(out2 - ref2)))

    # level=3 path with fade-in: img is (B, 1, 32, 32). A second alpha value
    # reuses the same compiled kernel (alpha lives in SMEM, not in the trace).
    x32 = jax.random.normal(xkey32, (4, 1, 32, 32), jnp.float32)
    out3 = jax.block_until_ready(discriminator_forward(params, x32, level=3, alpha=0.5))
    ref3 = discriminator_forward_ref(params, x32, level=3, alpha=0.5)
    assert out3.shape == (4, 2)
    assert jnp.allclose(out3, ref3, atol=2e-2, rtol=2e-2), float(jnp.max(jnp.abs(out3 - ref3)))

    out3b = jax.block_until_ready(discriminator_forward(params, x32, level=3, alpha=0.9))
    ref3b = discriminator_forward_ref(params, x32, level=3, alpha=0.9)
    assert jnp.allclose(out3b, ref3b, atol=2e-2, rtol=2e-2), float(jnp.max(jnp.abs(out3b - ref3b)))

    print("KERNEL_OK")
</pallas_src>

<mosaic_0001>
module attributes {stable_mosaic.version = 11 : i64} {
  func.func @_fused_fwd_kernel(%arg0: i32, %arg1: memref<1x1xf32, #tpu.memory_space<smem>>, %arg2: memref<8x64xf32, #tpu.memory_space<vmem>>, %arg3: memref<64x128xbf16, #tpu.memory_space<vmem>>, %arg4: memref<1x128xf32, #tpu.memory_space<vmem>>, %arg5: memref<128x128xbf16, #tpu.memory_space<vmem>>, %arg6: memref<1x128xf32, #tpu.memory_space<vmem>>, %arg7: memref<8x128xf32, #tpu.memory_space<vmem>>) attributes {dimension_semantics = [#tpu.dimension_semantics<parallel>], iteration_bounds = array<i64: 1>, scalar_prefetch = 0 : i64, scratch_operands = 0 : i64, tpu.core_type = #tpu.core_type<tc>, window_params = [{transform_indices = @transform_0, window_bounds = array<i64: 1, 1>}, {transform_indices = @transform_1, window_bounds = array<i64: 8, 64>}, {pipeline_mode = #tpu.pipeline_mode<synchronous>, transform_indices = @transform_2, window_bounds = array<i64: 64, 128>}, {pipeline_mode = #tpu.pipeline_mode<synchronous>, transform_indices = @transform_3, window_bounds = array<i64: 1, 128>}, {pipeline_mode = #tpu.pipeline_mode<synchronous>, transform_indices = @transform_4, window_bounds = array<i64: 128, 128>}, {pipeline_mode = #tpu.pipeline_mode<synchronous>, transform_indices = @transform_5, window_bounds = array<i64: 1, 128>}, {transform_indices = @transform_6, window_bounds = array<i64: 8, 128>}]} {
    %c0 = arith.constant 0 : index
    %c0_0 = arith.constant 0 : index
    %0 = vector.load %arg2[%c0, %c0_0] : memref<8x64xf32, #tpu.memory_space<vmem>>, vector<8x64xf32>
    %1 = arith.truncf %0 : vector<8x64xf32> to vector<8x64xbf16>
    %c0_1 = arith.constant 0 : index
    %c0_2 = arith.constant 0 : index
    %2 = vector.load %arg3[%c0_1, %c0_2] : memref<64x128xbf16, #tpu.memory_space<vmem>>, vector<64x128xbf16>
    %cst = arith.constant dense<0.000000e+00> : vector<8x128xf32>
    %3 = tpu.matmul %1, %2, %cst {dimension_numbers = #tpu.dot_dimension_numbers<[1], [0], [0], [1], [0, 0, 1, 1], [], []>} : vector<8x64xbf16>, vector<64x128xbf16>, vector<8x128xf32> -> vector<8x128xf32>
    %c0_3 = arith.constant 0 : index
    %c0_4 = arith.constant 0 : index
    %4 = vector.load %arg4[%c0_3, %c0_4] : memref<1x128xf32, #tpu.memory_space<vmem>>, vector<1x128xf32>
    %5 = vector.broadcast %4 : vector<1x128xf32> to vector<8x128xf32>
    %6 = arith.addf %3, %5 : vector<8x128xf32>
    %cst_5 = arith.constant 0.000000e+00 : f32
    %7 = vector.broadcast %cst_5 : f32 to vector<8x128xf32>
    %8 = arith.cmpf ogt, %6, %7 : vector<8x128xf32>
    %cst_6 = arith.constant 2.000000e-01 : f32
    %9 = vector.broadcast %cst_6 : f32 to vector<8x128xf32>
    %10 = arith.mulf %9, %6 : vector<8x128xf32>
    %11 = arith.select %8, %6, %10 : vector<8x128xi1>, vector<8x128xf32>
    %12 = arith.truncf %11 : vector<8x128xf32> to vector<8x128xbf16>
    %c0_7 = arith.constant 0 : index
    %c0_8 = arith.constant 0 : index
    %13 = vector.load %arg5[%c0_7, %c0_8] : memref<128x128xbf16, #tpu.memory_space<vmem>>, vector<128x128xbf16>
    %cst_9 = arith.constant dense<0.000000e+00> : vector<8x128xf32>
    %14 = tpu.matmul %12, %13, %cst_9 {dimension_numbers = #tpu.dot_dimension_numbers<[1], [0], [0], [1], [0, 0, 1, 1], [], []>} : vector<8x128xbf16>, vector<128x128xbf16>, vector<8x128xf32> -> vector<8x128xf32>
    %c0_10 = arith.constant 0 : index
    %c0_11 = arith.constant 0 : index
    %15 = vector.load %arg6[%c0_10, %c0_11] : memref<1x128xf32, #tpu.memory_space<vmem>>, vector<1x128xf32>
    %16 = vector.broadcast %15 : vector<1x128xf32> to vector<8x128xf32>
    %17 = arith.addf %14, %16 : vector<8x128xf32>
    %c0_12 = arith.constant 0 : index
    %c0_13 = arith.constant 0 : index
    %18 = vector.load %arg7[%c0_12, %c0_13] : memref<8x128xf32, #tpu.memory_space<vmem>>, vector<8x128xf32>
    tpu.vector_store %arg7[%c0_12, %c0_13], %17 {strides = array<i32>} : memref<8x128xf32, #tpu.memory_space<vmem>>, vector<8x128xf32>,
    return
  }
  func.func @transform_0(%arg0: i32) -> (i32, i32) {
    %c0_i32 = arith.constant 0 : i32
    %c0_i32_0 = arith.constant 0 : i32
    %c0_i32_1 = arith.constant 0 : i32
    return %c0_i32, %c0_i32_0 : i32, i32
  }
  func.func @transform_1(%arg0: i32) -> (i32, i32) {
    %c0_i32 = arith.constant 0 : i32
    %c0_i32_0 = arith.constant 0 : i32
    return %arg0, %c0_i32 : i32, i32
  }
  func.func @transform_2(%arg0: i32) -> (i32, i32) {
    %c0_i32 = arith.constant 0 : i32
    %c0_i32_0 = arith.constant 0 : i32
    %c0_i32_1 = arith.constant 0 : i32
    return %c0_i32, %c0_i32_0 : i32, i32
  }
  func.func @transform_3(%arg0: i32) -> (i32, i32) {
    %c0_i32 = arith.constant 0 : i32
    %c0_i32_0 = arith.constant 0 : i32
    %c0_i32_1 = arith.constant 0 : i32
    return %c0_i32, %c0_i32_0 : i32, i32
  }
  func.func @transform_4(%arg0: i32) -> (i32, i32) {
    %c0_i32 = arith.constant 0 : i32
    %c0_i32_0 = arith.constant 0 : i32
    %c0_i32_1 = arith.constant 0 : i32
    return %c0_i32, %c0_i32_0 : i32, i32
  }
  func.func @transform_5(%arg0: i32) -> (i32, i32) {
    %c0_i32 = arith.constant 0 : i32
    %c0_i32_0 = arith.constant 0 : i32
    %c0_i32_1 = arith.constant 0 : i32
    return %c0_i32, %c0_i32_0 : i32, i32
  }
  func.func @transform_6(%arg0: i32) -> (i32, i32) {
    %c0_i32 = arith.constant 0 : i32
    %c0_i32_0 = arith.constant 0 : i32
    return %arg0, %c0_i32 : i32, i32
  }
}

</mosaic_0001>

<bundles_post_ra>
// kernel: discriminator_forward.1
= control target key start
LH: loop header
LB: loop body
LE: loop exit
PB: predicated region body
PF: predicated region fallthrough
CT: control target
= control target key end

     0   :  { %12 = vsyncpa [#allocation4], 0  ;;  %s483_s0 = inlined_call_operand.<no memory space> [shape: f32[1,1], index: 0, kind: input, shape index: {}]   ;;  %s484_s1 = inlined_call_operand.vmem [shape: f32[8,64], index: 1, kind: input, shape index: {}]   ;;  %s485_s2 = inlined_call_operand.hbm [shape: bf16[64,128], index: 2, kind: input, shape index: {}]   ;;  %s486_s3 = inlined_call_operand.hbm [shape: f32[1,128], index: 3, kind: input, shape index: {}]   ;;  %s487_s4 = inlined_call_operand.vmem [shape: bf16[128,128], index: 4, kind: input, shape index: {}]   ;;  %s488_s5 = inlined_call_operand.vmem [shape: f32[1,128], index: 5, kind: input, shape index: {}]   ;;  %s489_s6 = inlined_call_operand.vmem [shape: f32[8,128], index: 6, kind: output, shape index: {}]  }
   0x1   :  { %13 = vsyncpa [#allocation6], 0  ;;  %s385_s0 = smov [#allocation3]   ;;  %s337_s24 = scalar_lea.hbm %s485_s2, 512 }
   0x2   :  { %s23_s21 = sshll.u32 %s385_s0, 4  ;;  %p338_p0 = scmp.ne.s32.totalorder %s485_s2, %s337_s24  ;;  %s24_s21 = int_to_ptr.vmem [resolvable:$true] %s23_s21 }
   0x3   :  { %p341_p1 = scmp.lt.u32.totalorder %s337_s24, %s485_s2 }
   0x5   :  { %p343_p2 = pnand %p341_p1, %p338_p0 }
   0x7   :  { %346 = shalt.err (!%p343_p2)
}
   0x8   :  { %s347_s29 = scalar_lea.vmem %s24_s21, 512  ;;  %p352_p4 = scmp.lt.s32.totalorder %s24_s21, %s24_s21 }
   0x9   :  { %p348_p3 = scmp.ne.s32.totalorder %s24_s21, %s347_s29  ;;  %p353_p5 = scmp.lt.s32.totalorder %s347_s29, %s347_s29 }
   0xb   :  { %p354_p6 = por %p353_p5, %p352_p4 }
   0xd   :  { %p355_p7 = pnand %p354_p6, %p348_p3 }
   0xf   :  { %358 = shalt.err (!%p355_p7)
}
  0x10   :  { %s386_s30 = smov 64   ;;  %s387_s7 = smov 4  }
  0x11   :  { %29 = dma.hbm_to_vmem [thread:$0]  %s485_s2, 512, %s24_s21, [#allocation4], %s386_s30, %s386_s30, %s387_s7  }
  0x12   :  { %s388_s10 = smov [#allocation5]   ;;  %s359_s14 = scalar_lea.hbm %s486_s3, 16 }
  0x13   :  { %s36_s11 = sshll.u32 %s388_s10, 4  ;;  %p360_p8 = scmp.ne.s32.totalorder %s486_s3, %s359_s14  ;;  %s37_s11 = int_to_ptr.vmem [resolvable:$true] %s36_s11 }
  0x14   :  { %p363_p9 = scmp.lt.u32.totalorder %s359_s14, %s486_s3 }
  0x16   :  { %p365_p10 = pnand %p363_p9, %p360_p8 }
  0x18   :  { %368 = shalt.err (!%p365_p10)
}
  0x19   :  { %s369_s19 = scalar_lea.vmem %s37_s11, 16  ;;  %s373_s2 = scalar_lea.vmem %s37_s11, 32 }
  0x1a   :  { %p370_p11 = scmp.ne.s32.totalorder %s37_s11, %s369_s19  ;;  %p374_p12 = scmp.lt.s32.totalorder %s37_s11, %s37_s11 }
  0x1b   :  { %p375_p13 = scmp.lt.s32.totalorder %s373_s2, %s369_s19 }
  0x1d   :  { %p376_p0 = por %p375_p13, %p374_p12 }
  0x1f   :  { %p377_p1 = pnand %p376_p0, %p370_p11 }
  0x21   :  { %380 = shalt.err (!%p377_p1)
}
  0x22   :  { %39 = dma.hbm_to_vmem [thread:$0]  %s486_s3, 16, %s37_s11, [#allocation6]  }
  0x23   :  { %381 = dma.done.wait [#allocation4], 512  }
  0x24   :  { %382 = vsyncadd [#allocation4], 4294966784 }
  0x25   :  { %383 = dma.done.wait [#allocation6], 16  }
  0x26   :  { %384 = vsyncadd [#allocation6], 4294967280  ;;  %v389_v0 = vmov 0.0   ;;  %vm390_vm0 = vmmov 0   ;;  %v325_v1 = vld [vmem:[#allocation3] sm:$0xff]   ;;  %v326_v2 = vld [vmem:[#allocation3 + $0x8] sm:$0xff]  }
  0x27   :  { %287 = vmatprep.subr.bf16.mxu0 %v389_v0  ;;  %295 = vmatprep.mubr.msk.bf16.mxu0 %vm390_vm0, %v389_v0  ;;  %v329_v3 = vld [vmem:[%s487_s4] sm:$0xff]   ;;  %v327_v4 = vld [vmem:[#allocation3 + $0x10] sm:$0xff]   ;;  %v330_v5 = vld [vmem:[%s487_s4 + $0x8] sm:$0xff]   ;;  %vm92_vm1 = vcmask 523264  }
  0x28   :  { %299 = vmatprep.subr.bf16.mxu1 %v389_v0  ;;  %315 = vmatprep.mubr.msk.bf16.mxu1 %vm390_vm0, %v389_v0  ;;  %v328_v6 = vld [vmem:[#allocation3 + $0x18] sm:$0xff]   ;;  %v51_v7 = vld [vmem:[%s484_s1] sm:$0xff]  ;;  %v331_v8 = vld [vmem:[%s487_s4 + $0x10] sm:$0xff]  }
  0x29   :  { %288 = vmatpush3.bf16.msra.mxu0 %v325_v1  ;;  %300 = vmatpush3.bf16.msra.mxu1 %v329_v3  ;;  %v52_v9 = vpack.c.bf16 %v51_v7, %v51_v7  ;;  %v332_v10 = vld [vmem:[%s487_s4 + $0x18] sm:$0xff]   ;;  %v333_v11 = vld [vmem:[%s487_s4 + $0x20] sm:$0xff]   ;;  %v334_v12 = vld [vmem:[%s487_s4 + $0x28] sm:$0xff]  }
  0x2a   :  { %289 = vmatprep.subr.bf16.mxu0 %v389_v0  ;;  %301 = vmatprep.subr.bf16.mxu1 %v389_v0  ;;  %v335_v13 = vld [vmem:[%s487_s4 + $0x30] sm:$0xff]   ;;  %v336_v14 = vld [vmem:[%s487_s4 + $0x38] sm:$0xff]   ;;  %v258_v15 = vld [vmem:[#allocation5] ss:$0 sm:$0xff] }
  0x2b   :  { %v264_v24 = vld [vmem:[%s488_s5] ss:$0 sm:$0xff] }
  0x2d   :  { %290 = vmatpush3.bf16.msra.mxu0 %v326_v2  ;;  %302 = vmatpush3.bf16.msra.mxu1 %v330_v5 }
  0x2e   :  { %291 = vmatprep.subr.bf16.mxu0 %v389_v0  ;;  %303 = vmatprep.subr.bf16.mxu1 %v389_v0 }
  0x31   :  { %292 = vmatpush3.bf16.msra.mxu0 %v327_v4  ;;  %304 = vmatpush3.bf16.msra.mxu1 %v331_v8 }
  0x32   :  { %293 = vmatprep.subr.bf16.mxu0 %v389_v0  ;;  %305 = vmatprep.subr.bf16.mxu1 %v389_v0 }
  0x35   :  { %294 = vmatpush3.bf16.msra.mxu0 %v328_v6  ;;  %306 = vmatpush3.bf16.msra.mxu1 %v332_v10 }
  0x36   :  { %307 = vmatprep.subr.bf16.mxu1 %v389_v0 }
  0x38   :  { %296 = vmatmul.mubr.msk.bf16.vlgmr.msra.gmra.mrb[0].mxu0 %vm92_vm1, %v52_v9 }
  0x39   :  { %308 = vmatpush3.bf16.msra.mxu1 %v333_v11 }
  0x3a   :  { %309 = vmatprep.subr.bf16.mxu1 %v389_v0 }
  0x3d   :  { %310 = vmatpush3.bf16.msra.mxu1 %v334_v12 }
  0x3e   :  { %311 = vmatprep.subr.bf16.mxu1 %v389_v0 }
  0x41   :  { %312 = vmatpush3.bf16.msra.mxu1 %v335_v13 }
  0x42   :  { %313 = vmatprep.subr.bf16.mxu1 %v389_v0 }
  0x45   :  { %314 = vmatpush3.bf16.msra.mxu1 %v336_v14 }
 0x10b   :  { %v130_v16 = vpop.f32.mrb[0].mxu0 }
 0x10c   :  { %v131_v17 = vadd.f32 %v258_v15, %v130_v16  ;;  %v297_v18 = vpop.f32.mrb[1].mxu0 }
 0x10d   :  { %v133_v19 = vpop.f32.mrb[2].mxu0 }
 0x10e   :  { %vm136_vm2 = vcmp.gt.f32.partialorder %v131_v17, 0.0  ;;  %v137_v20 = vmul.f32 0.2, %v131_v17  ;;  %v298_v21 = vpop.f32.mrb[3].mxu0 }
 0x110   :  { %v138_v22 = vsel %vm136_vm2, %v131_v17, %v137_v20 }
 0x111   :  { %v139_v23 = vpack.c.bf16 %v138_v22, %v138_v22 }
 0x113   :  { %316 = vmatmul.mubr.bf16.vlgmr.msra.gmra.mrb[0].mxu1 %v139_v23 }
 0x1e6   :  { %v245_v25 = vpop.f32.mrb[0].mxu1 }
 0x1e7   :  { %v246_v26 = vadd.f32 %v264_v24, %v245_v25  ;;  %v317_v27 = vpop.f32.mrb[1].mxu1 }
 0x1e8   :  { %v248_v28 = vpop.f32.mrb[2].mxu1 }
 0x1e9   :  { %251 = vst [vmem:[%s489_s6] sm:$0xff] %v246_v26  ;;  %v318_v29 = vpop.f32.mrb[3].mxu1 }
 0x1ea   :  { %256 = vsyncpa [#allocation4], 1 }
 0x1eb   :  { %257 = vsyncpa [#allocation6], 1 }

</bundles_post_ra>
